<compile_context>
chip_gen: v7x
topology: tpu7x:2x2x1
jax: 0.10.0
libtpu: 0.0.40
codegen_flags: <defaults>
</compile_context>

<pallas_src>
import functools

import jax
import jax.numpy as jnp
from jax.experimental import pallas as pl
from jax.experimental.pallas import tpu as pltpu


OUT_PAD = 128  # lane-dense width for the gating/output path (real n_out sliced in wrapper)


def _topic_ware_kernel(adj_ref, x_ref,
                       w1a_ref, w1b_ref, b1_ref,
                       w2a_ref, w2b_ref, b2_ref,
                       w3_ref, b3_ref,
                       out_ref, acc_ref, *, n_in, n_out):
    t = pl.program_id(0)

    @pl.when(t == 0)
    def _():
        acc_ref[...] = jnp.zeros_like(acc_ref)

    adj = adj_ref[...]                      # (N, N)       bf16, 0/1 values (exact)
    x = x_ref[...]                          # (N, n_in+1)  bf16, trailing ones column

    # conv1 aggregation; the trailing ones column makes the degree fall out of the same
    # MXU matmul with exact f32 accumulation (no XLU row-reduce, no bf16 degree error).
    nb1 = jnp.dot(adj, x, preferred_element_type=jnp.float32)        # (N, n_in+1)
    deg = nb1[:, n_in:n_in + 1] + 1e-7                               # (N, 1) exact row-sum
    # approx=True (EUP vrcp) is available, kept exact to match the reference tolerance.
    inv_deg = pl.reciprocal(deg, approx=False)

    # ----- conv1 (GraphSageLayer, ReLU); concat rewritten as split matmul -----
    # padded zero rows of w1a/w1b kill the ones/degree column contributions exactly.
    mean_nb1 = (nb1 * inv_deg).astype(jnp.bfloat16)
    h1 = (jnp.dot(x, w1a_ref[...], preferred_element_type=jnp.float32)
          + jnp.dot(mean_nb1, w1b_ref[...], preferred_element_type=jnp.float32)
          + b1_ref[...])
    h1 = jnp.maximum(h1, 0.0).astype(jnp.bfloat16)                   # (N, n_h)

    # ----- conv2 (GraphSageLayer, no activation) -----
    nb2 = jnp.dot(adj, h1, preferred_element_type=jnp.float32)
    mean_nb2 = (nb2 * inv_deg).astype(jnp.bfloat16)
    h2 = (jnp.dot(h1, w2a_ref[...], preferred_element_type=jnp.float32)
          + jnp.dot(mean_nb2, w2b_ref[...], preferred_element_type=jnp.float32)
          + b2_ref[...])
    h2 = h2.astype(jnp.bfloat16)                                     # (N, n_h)

    # ----- topic fc (lane-padded to OUT_PAD) + per-topic softmax gating -----
    lin = jnp.dot(h2, w3_ref[...], preferred_element_type=jnp.float32) + b3_ref[...]  # (N, OUT_PAD)
    valid = jax.lax.broadcasted_iota(jnp.int32, lin.shape, 1) < n_out
    lin_m = jnp.where(valid, lin, -jnp.inf)
    m = jnp.max(lin_m, axis=-1, keepdims=True)
    e = jnp.exp(lin_m - m)
    att = e / jnp.sum(e, axis=-1, keepdims=True)
    acc_ref[...] += att * lin               # padded cols: att == 0 and lin == 0 exactly

    # ----- sum over topics + final (masked) softmax -----
    @pl.when(t == pl.num_programs(0) - 1)
    def _():
        acc = jnp.where(valid, acc_ref[...], -jnp.inf)
        m2 = jnp.max(acc, axis=-1, keepdims=True)
        e2 = jnp.exp(acc - m2)
        out_ref[...] = (e2 / jnp.sum(e2, axis=-1, keepdims=True)).astype(out_ref.dtype)


def topic_ware_forward(adj_list, features, params):
    """Pallas implementation of topic_ware.forward (eval mode), mixed bf16/f32."""
    n_topic, N, _ = adj_list.shape
    n_in = features.shape[1]
    n_h = params["w1a"].shape[-1]
    n_out = params["w3"].shape[-1]
    assert n_out <= OUT_PAD
    n_in_aug = n_in + 1
    bf16, f32 = jnp.bfloat16, jnp.float32

    # bf16 storage for the dominant adjacency stream (0/1 is exact in bf16) and for all
    # MXU operands; every matmul accumulates in f32 via preferred_element_type.
    adj_bf = adj_list.astype(bf16)
    x_aug = jnp.concatenate([features, jnp.ones((N, 1), f32)], axis=1).astype(bf16)

    zrow = jnp.zeros((n_topic, 1, n_h), f32)
    w1a = jnp.concatenate([params["w1a"], zrow], axis=1).astype(bf16)  # zero row for ones col
    w1b = jnp.concatenate([params["w1b"], zrow], axis=1).astype(bf16)  # zero row for deg col
    w2a = params["w2a"].astype(bf16)
    w2b = params["w2b"].astype(bf16)
    w3 = jnp.concatenate(
        [params["w3"], jnp.zeros((n_topic, n_h, OUT_PAD - n_out), f32)], axis=2).astype(bf16)
    b3 = jnp.concatenate(
        [params["b3"], jnp.zeros((n_topic, 1, OUT_PAD - n_out), f32)], axis=2)
    b1 = params["b1"]
    b2 = params["b2"]

    # Explicit scoped-VMEM budget: double-buffered per-topic blocks + shared x / out / acc.
    bfb, f32b = 2, 4
    per_topic = (N * N * bfb + 2 * n_in_aug * n_h * bfb + 2 * n_h * n_h * bfb
                 + n_h * OUT_PAD * bfb + 2 * n_h * f32b + OUT_PAD * f32b)
    shared = N * n_in_aug * bfb + 2 * N * OUT_PAD * f32b + N * OUT_PAD * f32b
    vmem_limit = int(min(100 * 2 ** 20, max(32 * 2 ** 20, (2 * per_topic + shared) * 5 // 4)))

    grid_spec = pltpu.PrefetchScalarGridSpec(
        num_scalar_prefetch=0,
        grid=(n_topic,),
        in_specs=[
            pl.BlockSpec((None, N, N), lambda i: (i, 0, 0)),           # adj  (per topic)
            pl.BlockSpec((N, n_in_aug), lambda i: (0, 0)),             # x_aug (shared)
            pl.BlockSpec((None, n_in_aug, n_h), lambda i: (i, 0, 0)),  # w1a
            pl.BlockSpec((None, n_in_aug, n_h), lambda i: (i, 0, 0)),  # w1b
            pl.BlockSpec((None, 1, n_h), lambda i: (i, 0, 0)),         # b1
            pl.BlockSpec((None, n_h, n_h), lambda i: (i, 0, 0)),       # w2a
            pl.BlockSpec((None, n_h, n_h), lambda i: (i, 0, 0)),       # w2b
            pl.BlockSpec((None, 1, n_h), lambda i: (i, 0, 0)),         # b2
            pl.BlockSpec((None, n_h, OUT_PAD), lambda i: (i, 0, 0)),   # w3 (lane-padded)
            pl.BlockSpec((None, 1, OUT_PAD), lambda i: (i, 0, 0)),     # b3 (lane-padded)
        ],
        out_specs=pl.BlockSpec((N, OUT_PAD), lambda i: (0, 0)),
        scratch_shapes=[pltpu.VMEM((N, OUT_PAD), jnp.float32)],
    )

    kernel = functools.partial(_topic_ware_kernel, n_in=n_in, n_out=n_out)
    out = pl.pallas_call(
        kernel,
        out_shape=jax.ShapeDtypeStruct((N, OUT_PAD), jnp.float32),
        grid_spec=grid_spec,
        compiler_params=pltpu.CompilerParams(
            dimension_semantics=("arbitrary",),   # topic axis accumulates into acc_ref
            vmem_limit_bytes=vmem_limit),
    )(adj_bf, x_aug, w1a, w1b, b1, w2a, w2b, b2, w3, b3)
    return out[:, :n_out]


# ------------------------- pure-JAX reference -------------------------------
def topic_ware_reference(adj_list, features, params):
    """Pure-JAX reference mirroring the kernel's bf16-operand / f32-accumulate policy."""
    bf16, f32 = jnp.bfloat16, jnp.float32
    x = features.astype(bf16)
    out = jnp.zeros((features.shape[0], params["w3"].shape[-1]), f32)
    for i in range(adj_list.shape[0]):
        adj = adj_list[i].astype(bf16)
        deg = jnp.sum(adj.astype(f32), axis=1, keepdims=True) + 1e-7
        inv_deg = 1.0 / deg

        nb1 = jnp.dot(adj, x, preferred_element_type=f32)
        mean_nb1 = (nb1 * inv_deg).astype(bf16)
        h1 = (jnp.dot(x, params["w1a"][i].astype(bf16), preferred_element_type=f32)
              + jnp.dot(mean_nb1, params["w1b"][i].astype(bf16), preferred_element_type=f32)
              + params["b1"][i])
        h1 = jnp.maximum(h1, 0.0).astype(bf16)

        nb2 = jnp.dot(adj, h1, preferred_element_type=f32)
        mean_nb2 = (nb2 * inv_deg).astype(bf16)
        h2 = (jnp.dot(h1, params["w2a"][i].astype(bf16), preferred_element_type=f32)
              + jnp.dot(mean_nb2, params["w2b"][i].astype(bf16), preferred_element_type=f32)
              + params["b2"][i])
        h2 = h2.astype(bf16)

        lin = (jnp.dot(h2, params["w3"][i].astype(bf16), preferred_element_type=f32)
               + params["b3"][i])
        att = jax.nn.softmax(lin, axis=-1)
        out = out + att * lin
    return jax.nn.softmax(out, axis=-1)


# ------------------------- param init (deterministic) -----------------------
def xavier_uniform(key, shape):
    fan_in, fan_out = shape[-2], shape[-1]
    bound = (6.0 / (fan_in + fan_out)) ** 0.5
    return jax.random.uniform(key, shape, jnp.float32, -bound, bound)


def init_params(key, n_topic, n_in, n_h):
    ks = jax.random.split(key, 6)
    return {
        # GraphSage fc weights: Linear(2*d_in, d_out) split into [h | mean_neigh] halves
        "w1a": xavier_uniform(ks[0], (n_topic, n_in, n_h)),
        "w1b": xavier_uniform(ks[1], (n_topic, n_in, n_h)),
        "b1": jnp.zeros((n_topic, 1, n_h), jnp.float32),   # init_params -> constant 0
        "w2a": xavier_uniform(ks[2], (n_topic, n_h, n_h)),
        "w2b": xavier_uniform(ks[3], (n_topic, n_h, n_h)),
        "b2": jnp.zeros((n_topic, 1, n_h), jnp.float32),
        "w3": xavier_uniform(ks[4], (n_topic, n_h, 2)),
        "b3": 0.01 * jax.random.normal(ks[5], (n_topic, 1, 2), jnp.float32),
    }


if __name__ == "__main__":
    n_topic, N, n_in, n_h = 3, 8, 16, 32

    key = jax.random.PRNGKey(0)
    k_adj, k_feat, k_par = jax.random.split(key, 3)

    # random 0/1 adjacency with self-loops
    adj_list = (jax.random.uniform(k_adj, (n_topic, N, N)) > 0.5).astype(jnp.float32)
    adj_list = jnp.maximum(adj_list, jnp.eye(N, dtype=jnp.float32)[None])
    features = jax.random.normal(k_feat, (N, n_in), jnp.float32)

    params = init_params(k_par, n_topic, n_in, n_h)

    out = jax.block_until_ready(topic_ware_forward(adj_list, features, params))
    ref = topic_ware_reference(adj_list, features, params)

    assert out.shape == (N, 2)
    assert jnp.allclose(out, ref, atol=1e-4, rtol=1e-4), (out, ref)

    print("KERNEL_OK")
</pallas_src>

<mosaic_0001>
module attributes {stable_mosaic.version = 11 : i64} {
  func.func @_topic_ware_kernel(%arg0: i32, %arg1: memref<1x8x8xbf16, #tpu.memory_space<vmem>>, %arg2: memref<8x17xbf16, #tpu.memory_space<vmem>>, %arg3: memref<1x17x32xbf16, #tpu.memory_space<vmem>>, %arg4: memref<1x17x32xbf16, #tpu.memory_space<vmem>>, %arg5: memref<1x1x32xf32, #tpu.memory_space<vmem>>, %arg6: memref<1x32x32xbf16, #tpu.memory_space<vmem>>, %arg7: memref<1x32x32xbf16, #tpu.memory_space<vmem>>, %arg8: memref<1x1x32xf32, #tpu.memory_space<vmem>>, %arg9: memref<1x32x128xbf16, #tpu.memory_space<vmem>>, %arg10: memref<1x1x128xf32, #tpu.memory_space<vmem>>, %arg11: memref<8x128xf32, #tpu.memory_space<vmem>>, %arg12: memref<8x128xf32, #tpu.memory_space<vmem>>) attributes {dimension_semantics = [#tpu.dimension_semantics<arbitrary>], iteration_bounds = array<i64: 3>, scalar_prefetch = 0 : i64, scratch_operands = 1 : i64, tpu.core_type = #tpu.core_type<tc>, window_params = [{transform_indices = @transform_0, window_bounds = array<i64: 1, 8, 8>}, {pipeline_mode = #tpu.pipeline_mode<synchronous>, transform_indices = @transform_1, window_bounds = array<i64: 8, 17>}, {transform_indices = @transform_2, window_bounds = array<i64: 1, 17, 32>}, {transform_indices = @transform_3, window_bounds = array<i64: 1, 17, 32>}, {transform_indices = @transform_4, window_bounds = array<i64: 1, 1, 32>}, {transform_indices = @transform_5, window_bounds = array<i64: 1, 32, 32>}, {transform_indices = @transform_6, window_bounds = array<i64: 1, 32, 32>}, {transform_indices = @transform_7, window_bounds = array<i64: 1, 1, 32>}, {transform_indices = @transform_8, window_bounds = array<i64: 1, 32, 128>}, {transform_indices = @transform_9, window_bounds = array<i64: 1, 1, 128>}, {pipeline_mode = #tpu.pipeline_mode<synchronous>, transform_indices = @transform_10, window_bounds = array<i64: 8, 128>}]} {
    %c0_i32 = arith.constant 0 : i32
    %0 = arith.cmpi eq, %arg0, %c0_i32 : i32
    %1 = arith.extui %0 : i1 to i32
    %c0_i32_0 = arith.constant 0 : i32
    %2 = arith.cmpi ne, %1, %c0_i32_0 : i32
    scf.if %2 {
      %cst_46 = arith.constant 0.000000e+00 : f32
      %72 = vector.broadcast %cst_46 : f32 to vector<8x128xf32>
      %c0_47 = arith.constant 0 : index
      %c0_48 = arith.constant 0 : index
      %73 = vector.load %arg12[%c0_47, %c0_48] : memref<8x128xf32, #tpu.memory_space<vmem>>, vector<8x128xf32>
      tpu.vector_store %arg12[%c0_47, %c0_48], %72 {strides = array<i32>} : memref<8x128xf32, #tpu.memory_space<vmem>>, vector<8x128xf32>,
    } else {
    }
    %c0 = arith.constant 0 : index
    %c0_1 = arith.constant 0 : index
    %c0_2 = arith.constant 0 : index
    %3 = vector.load %arg1[%c0, %c0_1, %c0_2] : memref<1x8x8xbf16, #tpu.memory_space<vmem>>, vector<1x8x8xbf16>
    %4 = vector.shape_cast %3 : vector<1x8x8xbf16> to vector<8x8xbf16>
    %c0_3 = arith.constant 0 : index
    %c0_4 = arith.constant 0 : index
    %5 = vector.load %arg2[%c0_3, %c0_4] : memref<8x17xbf16, #tpu.memory_space<vmem>>, vector<8x17xbf16>
    %cst = arith.constant dense<0.000000e+00> : vector<8x17xf32>
    %6 = tpu.matmul %4, %5, %cst {dimension_numbers = #tpu.dot_dimension_numbers<[1], [0], [0], [1], [0, 0, 1, 1], [], []>} : vector<8x8xbf16>, vector<8x17xbf16>, vector<8x17xf32> -> vector<8x17xf32>
    %7 = vector.extract_strided_slice %6 {offsets = [0, 16], sizes = [8, 1], strides = [1, 1]} : vector<8x17xf32> to vector<8x1xf32>
    %cst_5 = arith.constant 1.000000e-07 : f32
    %8 = vector.broadcast %cst_5 : f32 to vector<8x1xf32>
    %9 = arith.addf %7, %8 : vector<8x1xf32>
    %10 = tpu.reciprocal %9 : vector<8x1xf32> -> vector<8x1xf32>
    %11 = vector.broadcast %10 : vector<8x1xf32> to vector<8x17xf32>
    %12 = arith.mulf %6, %11 : vector<8x17xf32>
    %13 = arith.truncf %12 : vector<8x17xf32> to vector<8x17xbf16>
    %c0_6 = arith.constant 0 : index
    %c0_7 = arith.constant 0 : index
    %c0_8 = arith.constant 0 : index
    %14 = vector.load %arg3[%c0_6, %c0_7, %c0_8] : memref<1x17x32xbf16, #tpu.memory_space<vmem>>, vector<1x17x32xbf16>
    %15 = vector.shape_cast %14 : vector<1x17x32xbf16> to vector<17x32xbf16>
    %cst_9 = arith.constant dense<0.000000e+00> : vector<8x32xf32>
    %16 = tpu.matmul %5, %15, %cst_9 {dimension_numbers = #tpu.dot_dimension_numbers<[1], [0], [0], [1], [0, 0, 1, 1], [], []>} : vector<8x17xbf16>, vector<17x32xbf16>, vector<8x32xf32> -> vector<8x32xf32>
    %c0_10 = arith.constant 0 : index
    %c0_11 = arith.constant 0 : index
    %c0_12 = arith.constant 0 : index
    %17 = vector.load %arg4[%c0_10, %c0_11, %c0_12] : memref<1x17x32xbf16, #tpu.memory_space<vmem>>, vector<1x17x32xbf16>
    %18 = vector.shape_cast %17 : vector<1x17x32xbf16> to vector<17x32xbf16>
    %cst_13 = arith.constant dense<0.000000e+00> : vector<8x32xf32>
    %19 = tpu.matmul %13, %18, %cst_13 {dimension_numbers = #tpu.dot_dimension_numbers<[1], [0], [0], [1], [0, 0, 1, 1], [], []>} : vector<8x17xbf16>, vector<17x32xbf16>, vector<8x32xf32> -> vector<8x32xf32>
    %20 = arith.addf %16, %19 : vector<8x32xf32>
    %c0_14 = arith.constant 0 : index
    %c0_15 = arith.constant 0 : index
    %c0_16 = arith.constant 0 : index
    %21 = vector.load %arg5[%c0_14, %c0_15, %c0_16] : memref<1x1x32xf32, #tpu.memory_space<vmem>>, vector<1x1x32xf32>
    %22 = vector.shape_cast %21 : vector<1x1x32xf32> to vector<1x32xf32>
    %23 = vector.broadcast %22 : vector<1x32xf32> to vector<8x32xf32>
    %24 = arith.addf %20, %23 : vector<8x32xf32>
    %cst_17 = arith.constant 0.000000e+00 : f32
    %25 = vector.broadcast %cst_17 : f32 to vector<8x32xf32>
    %26 = arith.maximumf %24, %25 : vector<8x32xf32>
    %27 = arith.truncf %26 : vector<8x32xf32> to vector<8x32xbf16>
    %cst_18 = arith.constant dense<0.000000e+00> : vector<8x32xf32>
    %28 = tpu.matmul %4, %27, %cst_18 {dimension_numbers = #tpu.dot_dimension_numbers<[1], [0], [0], [1], [0, 0, 1, 1], [], []>} : vector<8x8xbf16>, vector<8x32xbf16>, vector<8x32xf32> -> vector<8x32xf32>
    %29 = vector.broadcast %10 : vector<8x1xf32> to vector<8x32xf32>
    %30 = arith.mulf %28, %29 : vector<8x32xf32>
    %31 = arith.truncf %30 : vector<8x32xf32> to vector<8x32xbf16>
    %c0_19 = arith.constant 0 : index
    %c0_20 = arith.constant 0 : index
    %c0_21 = arith.constant 0 : index
    %32 = vector.load %arg6[%c0_19, %c0_20, %c0_21] : memref<1x32x32xbf16, #tpu.memory_space<vmem>>, vector<1x32x32xbf16>
    %33 = vector.shape_cast %32 : vector<1x32x32xbf16> to vector<32x32xbf16>
    %cst_22 = arith.constant dense<0.000000e+00> : vector<8x32xf32>
    %34 = tpu.matmul %27, %33, %cst_22 {dimension_numbers = #tpu.dot_dimension_numbers<[1], [0], [0], [1], [0, 0, 1, 1], [], []>} : vector<8x32xbf16>, vector<32x32xbf16>, vector<8x32xf32> -> vector<8x32xf32>
    %c0_23 = arith.constant 0 : index
    %c0_24 = arith.constant 0 : index
    %c0_25 = arith.constant 0 : index
    %35 = vector.load %arg7[%c0_23, %c0_24, %c0_25] : memref<1x32x32xbf16, #tpu.memory_space<vmem>>, vector<1x32x32xbf16>
    %36 = vector.shape_cast %35 : vector<1x32x32xbf16> to vector<32x32xbf16>
    %cst_26 = arith.constant dense<0.000000e+00> : vector<8x32xf32>
    %37 = tpu.matmul %31, %36, %cst_26 {dimension_numbers = #tpu.dot_dimension_numbers<[1], [0], [0], [1], [0, 0, 1, 1], [], []>} : vector<8x32xbf16>, vector<32x32xbf16>, vector<8x32xf32> -> vector<8x32xf32>
    %38 = arith.addf %34, %37 : vector<8x32xf32>
    %c0_27 = arith.constant 0 : index
    %c0_28 = arith.constant 0 : index
    %c0_29 = arith.constant 0 : index
    %39 = vector.load %arg8[%c0_27, %c0_28, %c0_29] : memref<1x1x32xf32, #tpu.memory_space<vmem>>, vector<1x1x32xf32>
    %40 = vector.shape_cast %39 : vector<1x1x32xf32> to vector<1x32xf32>
    %41 = vector.broadcast %40 : vector<1x32xf32> to vector<8x32xf32>
    %42 = arith.addf %38, %41 : vector<8x32xf32>
    %43 = arith.truncf %42 : vector<8x32xf32> to vector<8x32xbf16>
    %c0_30 = arith.constant 0 : index
    %c0_31 = arith.constant 0 : index
    %c0_32 = arith.constant 0 : index
    %44 = vector.load %arg9[%c0_30, %c0_31, %c0_32] : memref<1x32x128xbf16, #tpu.memory_space<vmem>>, vector<1x32x128xbf16>
    %45 = vector.shape_cast %44 : vector<1x32x128xbf16> to vector<32x128xbf16>
    %cst_33 = arith.constant dense<0.000000e+00> : vector<8x128xf32>
    %46 = tpu.matmul %43, %45, %cst_33 {dimension_numbers = #tpu.dot_dimension_numbers<[1], [0], [0], [1], [0, 0, 1, 1], [], []>} : vector<8x32xbf16>, vector<32x128xbf16>, vector<8x128xf32> -> vector<8x128xf32>
    %c0_34 = arith.constant 0 : index
    %c0_35 = arith.constant 0 : index
    %c0_36 = arith.constant 0 : index
    %47 = vector.load %arg10[%c0_34, %c0_35, %c0_36] : memref<1x1x128xf32, #tpu.memory_space<vmem>>, vector<1x1x128xf32>
    %48 = vector.shape_cast %47 : vector<1x1x128xf32> to vector<1x128xf32>
    %49 = vector.broadcast %48 : vector<1x128xf32> to vector<8x128xf32>
    %50 = arith.addf %46, %49 : vector<8x128xf32>
    %51 = tpu.iota {dimensions = array<i32: 1>} : vector<8x128xi32>
    %c2_i32 = arith.constant 2 : i32
    %52 = vector.broadcast %c2_i32 : i32 to vector<8x128xi32>
    %53 = arith.cmpi slt, %51, %52 : vector<8x128xi32>
    %cst_37 = arith.constant 0xFF800000 : f32
    %54 = vector.broadcast %cst_37 : f32 to vector<8x128xf32>
    %55 = arith.select %53, %50, %54 : vector<8x128xi1>, vector<8x128xf32>
    %cst_38 = arith.constant dense<0xFF800000> : vector<8xf32>
    %56 = vector.multi_reduction <maximumf>, %55, %cst_38 [1] : vector<8x128xf32> to vector<8xf32>
    %57 = vector.shape_cast %56 : vector<8xf32> to vector<8x1xf32>
    %58 = vector.broadcast %57 : vector<8x1xf32> to vector<8x128xf32>
    %59 = arith.subf %55, %58 : vector<8x128xf32>
    %60 = math.exp %59 : vector<8x128xf32>
    %cst_39 = arith.constant dense<0.000000e+00> : vector<8xf32>
    %61 = vector.multi_reduction <add>, %60, %cst_39 [1] : vector<8x128xf32> to vector<8xf32>
    %62 = vector.shape_cast %61 : vector<8xf32> to vector<8x1xf32>
    %63 = vector.broadcast %62 : vector<8x1xf32> to vector<8x128xf32>
    %64 = arith.divf %60, %63 : vector<8x128xf32>
    %c0_40 = arith.constant 0 : index
    %c0_41 = arith.constant 0 : index
    %65 = vector.load %arg12[%c0_40, %c0_41] : memref<8x128xf32, #tpu.memory_space<vmem>>, vector<8x128xf32>
    %66 = arith.mulf %64, %50 : vector<8x128xf32>
    %67 = arith.addf %65, %66 : vector<8x128xf32>
    %c0_42 = arith.constant 0 : index
    %c0_43 = arith.constant 0 : index
    %68 = vector.load %arg12[%c0_42, %c0_43] : memref<8x128xf32, #tpu.memory_space<vmem>>, vector<8x128xf32>
    tpu.vector_store %arg12[%c0_42, %c0_43], %67 {strides = array<i32>} : memref<8x128xf32, #tpu.memory_space<vmem>>, vector<8x128xf32>,
    %c2_i32_44 = arith.constant 2 : i32
    %69 = arith.cmpi eq, %arg0, %c2_i32_44 : i32
    %70 = arith.extui %69 : i1 to i32
    %c0_i32_45 = arith.constant 0 : i32
    %71 = arith.cmpi ne, %70, %c0_i32_45 : i32
    scf.if %71 {
      %c0_46 = arith.constant 0 : index
      %c0_47 = arith.constant 0 : index
      %72 = vector.load %arg12[%c0_46, %c0_47] : memref<8x128xf32, #tpu.memory_space<vmem>>, vector<8x128xf32>
      %cst_48 = arith.constant 0xFF800000 : f32
      %73 = vector.broadcast %cst_48 : f32 to vector<8x128xf32>
      %74 = arith.select %53, %72, %73 : vector<8x128xi1>, vector<8x128xf32>
      %cst_49 = arith.constant dense<0xFF800000> : vector<8xf32>
      %75 = vector.multi_reduction <maximumf>, %74, %cst_49 [1] : vector<8x128xf32> to vector<8xf32>
      %76 = vector.shape_cast %75 : vector<8xf32> to vector<8x1xf32>
      %77 = vector.broadcast %76 : vector<8x1xf32> to vector<8x128xf32>
      %78 = arith.subf %74, %77 : vector<8x128xf32>
      %79 = math.exp %78 : vector<8x128xf32>
      %cst_50 = arith.constant dense<0.000000e+00> : vector<8xf32>
      %80 = vector.multi_reduction <add>, %79, %cst_50 [1] : vector<8x128xf32> to vector<8xf32>
      %81 = vector.shape_cast %80 : vector<8xf32> to vector<8x1xf32>
      %82 = vector.broadcast %81 : vector<8x1xf32> to vector<8x128xf32>
      %83 = arith.divf %79, %82 : vector<8x128xf32>
      %c0_51 = arith.constant 0 : index
      %c0_52 = arith.constant 0 : index
      %84 = vector.load %arg11[%c0_51, %c0_52] : memref<8x128xf32, #tpu.memory_space<vmem>>, vector<8x128xf32>
      tpu.vector_store %arg11[%c0_51, %c0_52], %83 {strides = array<i32>} : memref<8x128xf32, #tpu.memory_space<vmem>>, vector<8x128xf32>,
    } else {
    }
    return
  }
  func.func @transform_0(%arg0: i32) -> (i32, i32, i32) {
    %c0_i32 = arith.constant 0 : i32
    %c0_i32_0 = arith.constant 0 : i32
    %c0_i32_1 = arith.constant 0 : i32
    return %arg0, %c0_i32, %c0_i32_0 : i32, i32, i32
  }
  func.func @transform_1(%arg0: i32) -> (i32, i32) {
    %c0_i32 = arith.constant 0 : i32
    %c0_i32_0 = arith.constant 0 : i32
    %c0_i32_1 = arith.constant 0 : i32
    return %c0_i32, %c0_i32_0 : i32, i32
  }
  func.func @transform_2(%arg0: i32) -> (i32, i32, i32) {
    %c0_i32 = arith.constant 0 : i32
    %c0_i32_0 = arith.constant 0 : i32
    %c0_i32_1 = arith.constant 0 : i32
    return %arg0, %c0_i32, %c0_i32_0 : i32, i32, i32
  }
  func.func @transform_3(%arg0: i32) -> (i32, i32, i32) {
    %c0_i32 = arith.constant 0 : i32
    %c0_i32_0 = arith.constant 0 : i32
    %c0_i32_1 = arith.constant 0 : i32
    return %arg0, %c0_i32, %c0_i32_0 : i32, i32, i32
  }
  func.func @transform_4(%arg0: i32) -> (i32, i32, i32) {
    %c0_i32 = arith.constant 0 : i32
    %c0_i32_0 = arith.constant 0 : i32
    %c0_i32_1 = arith.constant 0 : i32
    return %arg0, %c0_i32, %c0_i32_0 : i32, i32, i32
  }
  func.func @transform_5(%arg0: i32) -> (i32, i32, i32) {
    %c0_i32 = arith.constant 0 : i32
    %c0_i32_0 = arith.constant 0 : i32
    %c0_i32_1 = arith.constant 0 : i32
    return %arg0, %c0_i32, %c0_i32_0 : i32, i32, i32
  }
  func.func @transform_6(%arg0: i32) -> (i32, i32, i32) {
    %c0_i32 = arith.constant 0 : i32
    %c0_i32_0 = arith.constant 0 : i32
    %c0_i32_1 = arith.constant 0 : i32
    return %arg0, %c0_i32, %c0_i32_0 : i32, i32, i32
  }
  func.func @transform_7(%arg0: i32) -> (i32, i32, i32) {
    %c0_i32 = arith.constant 0 : i32
    %c0_i32_0 = arith.constant 0 : i32
    %c0_i32_1 = arith.constant 0 : i32
    return %arg0, %c0_i32, %c0_i32_0 : i32, i32, i32
  }
  func.func @transform_8(%arg0: i32) -> (i32, i32, i32) {
    %c0_i32 = arith.constant 0 : i32
    %c0_i32_0 = arith.constant 0 : i32
    %c0_i32_1 = arith.constant 0 : i32
    return %arg0, %c0_i32, %c0_i32_0 : i32, i32, i32
  }
  func.func @transform_9(%arg0: i32) -> (i32, i32, i32) {
    %c0_i32 = arith.constant 0 : i32
    %c0_i32_0 = arith.constant 0 : i32
    %c0_i32_1 = arith.constant 0 : i32
    return %arg0, %c0_i32, %c0_i32_0 : i32, i32, i32
  }
  func.func @transform_10(%arg0: i32) -> (i32, i32) {
    %c0_i32 = arith.constant 0 : i32
    %c0_i32_0 = arith.constant 0 : i32
    %c0_i32_1 = arith.constant 0 : i32
    return %c0_i32, %c0_i32_0 : i32, i32
  }
}

</mosaic_0001>

<bundles_post_ra>
// kernel: tpu_custom_call.1
= control target key start
LH: loop header
LB: loop body
LE: loop exit
PB: predicated region body
PF: predicated region fallthrough
CT: control target
= control target key end

     0   :  { %s1809_s0 = inlined_call_operand.hbm [shape: bf16[3,8,8], index: 0, kind: input, shape index: {}]   ;;  %s1810_s1 = inlined_call_operand.hbm [shape: bf16[8,17], index: 1, kind: input, shape index: {}]   ;;  %s1811_s2 = inlined_call_operand.vmem [shape: bf16[3,17,32], index: 2, kind: input, shape index: {}]   ;;  %s1812_s3 = inlined_call_operand.vmem [shape: bf16[3,17,32], index: 3, kind: input, shape index: {}]   ;;  %s1813_s4 = inlined_call_operand.vmem [shape: f32[3,1,32], index: 4, kind: input, shape index: {}]   ;;  %s1814_s5 = inlined_call_operand.vmem [shape: bf16[3,32,32], index: 5, kind: input, shape index: {}]   ;;  %s1815_s6 = inlined_call_operand.vmem [shape: bf16[3,32,32], index: 6, kind: input, shape index: {}]   ;;  %s1816_s7 = inlined_call_operand.vmem [shape: f32[3,1,32], index: 7, kind: input, shape index: {}]   ;;  %s1817_s8 = inlined_call_operand.vmem [shape: bf16[3,32,128], index: 8, kind: input, shape index: {}]   ;;  %s1818_s9 = inlined_call_operand.vmem [shape: f32[3,1,128], index: 9, kind: input, shape index: {}]   ;;  %s1819_s10 = inlined_call_operand.hbm [shape: f32[8,128], index: 10, kind: output, shape index: {}]  }
   0x1   :  { %1823 = sst [smem:[#allocation13_spill]] %s1809_s0 }
   0x2   :  { %1824 = sst [smem:[#allocation14_spill]] %s1810_s1 }
   0x3   :  { %1825 = sst [smem:[#allocation15_spill]] %s1811_s2 }
   0x4   :  { %15 = vsyncpa [#allocation4], 0 }
   0x5   :  { %17 = vsyncpa [#allocation4 + $0x1], 0 }
   0x6   :  { %18 = vsyncpa [#allocation7], 0 }
   0x7   :  { %19 = vsyncpa [#allocation5], 0  ;;  %s1529_s13 = smov 0   ;;  %s1531_s14 = smov 0  }
   0x8   :  { %s1533_s15 = smov 0   ;;  %s1535_s16 = smov 0  }
   0x9 LB: > { %s1548_s17 = sadd.s32 4294967295, %s1464_s16   ;;  %p45_p0 = scmp.ne.s32.totalorder %s1456_s14, %s1452_s13  ;;  %s1464_s16 = sphi %s1535_s16, %s1848_s16   ;;  %s1460_s15 = sphi %s1533_s15, %s1847_s15   ;;  %s1456_s14 = sphi %s1531_s14, %s1846_s14   ;;  %s1452_s13 = sphi %s1529_s13, %s1845_s13  }
   0xa   : > { %p1820_p1 = scmp.eq.s32.totalorder %s1548_s17, 0  ;;  %p1138_p2 = scmp.ge.s32.totalorder %s1464_s16, 1 }
   0xb   : > { %p306_p3 = scmp.lt.s32.totalorder %s1464_s16, 4  ;;  %s1466_s20 = smov [#allocation6]  }
   0xc   : > { %p1557_p5 = por %p1820_p1, %p45_p0  ;;  %s319_s21 = sshll.u32 %s1466_s20, 4  ;;  %s320_s21 = int_to_ptr.vmem [resolvable:$true] %s319_s21 }
   0xd   : > { %p1561_p6 = pnand %p1138_p2, %p306_p3  ;;  %s1568_s22 = sadd.s32 1, %s1464_s16  }
   0xe   : > { %s1826_s18 = scalar_select %p1557_p5, 1, 0 }
   0xf   : > { %s1827_s19 = scalar_select %p1561_p6, 1, 0 }
  0x10   : > { %p1265_p7 = pneg %p1561_p6  ;;  %s29_s24 = ssub.s32 %s1464_s16, %s1568_s22 }
  0x11   : > { %p1578_p9 = scmp.eq.s32.totalorder %s29_s24, 0  ;;  %s32_s26 = sadd.s32 1, %s1460_s15 }
  0x12   : > { %p1572_p8 = pnand %p1265_p7, %p1820_p1  ;;  %s1830_s1 = sld [smem:[#allocation14_spill]] }
  0x13   : > { %s1829_s25 = scalar_select %p1578_p9, 1, 0 }
  0x14   : > { %p1340_p12 = pneg %p1572_p8 }
  0x18   : > { %s1338_s29 = scalar_lea.hbm %s1830_s1, 64 }
  0x19   : > { %p1339_p11 = scmp.ne.s32.totalorder %s1830_s1, %s1338_s29  ;;  %p1345_p2 = scmp.lt.u32.totalorder %s1338_s29, %s1830_s1 }
  0x1b   : > { %p1341_p13 = pnand %p1340_p12, %p1339_p11 }
  0x1d   : > { %p1342_p0 = pneg %p1341_p13 }
  0x1f   : > { %p1347_p3 = pnand %p1345_p2, %p1342_p0 }
  0x21   : > { %1350 = shalt.err (!%p1347_p3)
}
  0x22   : > { %s1351_s20 = scalar_lea.vmem %s320_s21, 64  ;;  %p1359_p10 = scmp.lt.s32.totalorder %s320_s21, %s320_s21 }
  0x23   : > { %p1352_p7 = scmp.ne.s32.totalorder %s320_s21, %s1351_s20  ;;  %p1360_p5 = scmp.lt.s32.totalorder %s1351_s20, %s1351_s20 }
  0x25   : > { %p1354_p4 = pnand %p1352_p7, %p1340_p12  ;;  %p1361_p6 = por %p1360_p5, %p1359_p10 }
  0x27   : > { %p1355_p1 = pneg %p1354_p4 }
  0x29   : > { %p1362_p9 = pnand %p1361_p6, %p1355_p1 }
  0x2b   : > { %1365 = shalt.err (!%p1362_p9)
}
  0x2c   : > { %1268 = dma.hbm_to_vmem [thread:$0]  (!%p1572_p8), %s1830_s1, 64, %s320_s21, [#allocation7]  }
  0x2d   : > { %p1831_p4 = scmp.ne.s32.totalorder %s1829_s25, 0  ;;  %p40_p5 = scmp.eq.s32.totalorder %s1464_s16, 0 }
  0x2e   : > { %p1274_p1 = scmp.lt.s32.totalorder %s1464_s16, 3  ;;  %s330_s29 = sand.u32 1, %s1460_s15  }
  0x2f   : > { %s1604_s28 = scalar_select %p1831_p4, %s1460_s15, %s32_s26  }
  0x30   : > { %s1142_s30 = sshll.u32 %s1464_s16, 6  ;;  %p1833_p6 = scmp.ne.s32.totalorder %s1460_s15, %s1456_s14 }
  0x31   : > { %1832 = sst [smem:[#allocation12_spill]] %s1604_s28  ;;  %s1141_s23 = sshll.u32 %s330_s29, 2 }
  0x32   : > { %p41_p9 = por %p40_p5, %p1833_p6  ;;  %s1834_s0 = sld [smem:[#allocation13_spill]] }
  0x33   : > { %s334_s25 = scalar_lea.vmem [#allocation3], %s1141_s23  ;;  %s331_s26 = scalar_lea.sflag [#allocation4], %s330_s29 }
  0x34   : > { %p1618_p8 = pnand %p1274_p1, %p41_p9  ;;  %s341_s16 = sshll.u32 %s334_s25, 4  ;;  %s1622_s16 = int_to_ptr.vmem [resolvable:$true] %s341_s16 }
  0x36   : > { %p1368_p11 = pneg %p1618_p8 }
  0x38   : > { %s1616_s13 = scalar_lea.hbm %s1834_s0, %s1142_s30  ;;  %s1371_s30 = scalar_lea.hbm %s1834_s0, 192 }
  0x39   : > { %s1366_s20 = scalar_lea.hbm %s1616_s13, 64  ;;  %p1372_p0 = scmp.lt.u32.totalorder %s1616_s13, %s1834_s0 }
  0x3a   : > { %p1367_p10 = scmp.ne.s32.totalorder %s1616_s13, %s1366_s20  ;;  %p1373_p2 = scmp.lt.u32.totalorder %s1371_s30, %s1366_s20 }
  0x3b   : > { %p1375_p7 = scmp.lt.u32.totalorder %s1366_s20, %s1616_s13 }
  0x3c   : > { %p1369_p12 = pnand %p1368_p11, %p1367_p10  ;;  %p1374_p3 = por %p1373_p2, %p1372_p0 }
  0x3e   : > { %p1370_p13 = pneg %p1369_p12  ;;  %p1376_p4 = por %p1375_p7, %p1374_p3 }
  0x40   : > { %p1377_p5 = pnand %p1376_p4, %p1370_p13 }
  0x42   : > { %1380 = shalt.err (!%p1377_p5)
}
  0x43   : > { %s1381_s29 = scalar_lea.vmem %s1622_s16, 64  ;;  %s1467_s23 = smov [#allocation3]  }
  0x44   : > { %p1382_p1 = scmp.ne.s32.totalorder %s1622_s16, %s1381_s29  ;;  %s1386_s25 = sshll.u32 %s1467_s23, 4  ;;  %s1387_s25 = int_to_ptr.vmem [resolvable:$false] %s1386_s25 }
  0x45   : > { %s1388_s24 = scalar_lea.vmem %s1387_s25, 128  ;;  %p1389_p10 = scmp.lt.s32.totalorder %s1622_s16, %s1387_s25 }
  0x46   : > { %p1384_p6 = pnand %p1382_p1, %p1368_p11  ;;  %p1390_p12 = scmp.lt.s32.totalorder %s1388_s24, %s1381_s29 }
  0x48   : > { %p1385_p9 = pneg %p1384_p6  ;;  %p1391_p0 = por %p1390_p12, %p1389_p10 }
  0x4a   : > { %p1392_p2 = pnand %p1391_p0, %p1385_p9 }
  0x4c   : > { %1395 = shalt.err (!%p1392_p2)
}
  0x4d   : > { %1272 = dma.hbm_to_vmem [thread:$0]  (!%p1618_p8), %s1616_s13, 64, %s1622_s16, %s331_s26  }
  0x4e   : > { %p1836_p13 = scmp.ne.s32.totalorder %s1827_s19, 0 }
  0x4f   : > { %s410_s20 = sand.u32 (!%p1836_p13), 1, %s1456_s14   ;;  %p1837_p11 = scmp.ne.s32.totalorder (!%p1836_p13), %s1826_s18, 0 }
  0x50   : > { %408 = sbr.rel (%p1836_p13) target bundleno = 1999 (0x7cf), region = 60  ;;  %s1652_s27 = sshll.u32 (!%p1836_p13), %s410_s20, 2 }
  0x51   : > { %s411_s30 = scalar_lea.sflag (!%p1836_p13), [#allocation4], %s410_s20  ;;  %s414_s11 = scalar_lea.vmem (!%p1836_p13), [#allocation3], %s1652_s27 }
  0x57   : > { %1439 = dma.done.wait (%p1837_p11), %s411_s30, 64  }
  0x58   : > { %1441 = vsyncadd (%p1837_p11), %s411_s30, 4294967232  ;;  %p1838_p3 = scmp.eq.s32.totalorder %s1548_s17, 0 }
  0x5a   : > { %1443 = dma.done.wait (%p1838_p3), [#allocation7], 64   ;;  %p1839_p8 = pmov %p1838_p3 }
  0x5b   : > { %p484_p7 = scmp.lt.s32.totalorder %s1548_s17, 2  ;;  %s1840_s2 = sld [smem:[#allocation15_spill]] }
  0x5c   : > { %1445 = vsyncadd (%p1839_p8), [#allocation7], 4294967232  ;;  %p1841_p4 = scmp.ne.s32.totalorder %s1548_s17, 0 }
  0x5d   : > { %s1665_s19 = scalar_select %p484_p7, %s1548_s17, 2 }
  0x5e   : > { %522 = sbr.rel (%p1841_p4) target bundleno = 101 (0x65), region = 72  ;;  %v1468_v0 = vmov (!%p1841_p4), 0.0  }
  0x5f   : > { %s1254_s13 = smul.u32 12, %s1665_s19  ;;  %s1180_s26 = sshll.u32 %s1665_s19, 4  ;;  %523 = vst [vmem:[#allocation2] sm:$0xff] (!%p1841_p4), %v1468_v0 }
  0x60   : > { %s1690_s21 = scalar_lea.vmem %s1814_s5, %s1180_s26  ;;  %s1695_s12 = scalar_lea.vmem %s1815_s6, %s1180_s26 }
  0x61   : > { %s1680_s20 = scalar_lea.vmem %s1840_s2, %s1254_s13  ;;  %s1685_s0 = scalar_lea.vmem %s1812_s3, %s1254_s13 }
  0x62   : > { %s1700_s25 = scalar_lea.vmem %s1817_s8, %s1180_s26  ;;  %s517_s13 = scalar_lea.vmem %s1818_s9, %s1665_s19 }
  0x65 PF: > { %v525_v1 = vld [vmem:[#allocation6] sm:$0xf]  ;;  %vm530_vm0 = vcmask 1043456   ;;  %v1469_v2 = vmov 0.0   ;;  %vm1470_vm1 = vmmov 0   ;;  %vm526_vm2 = vcmask 64512   ;;  %s1842_s2 = scalar_lea.vmem %s1813_s4, %s1665_s19  ;;  %s1843_s16 = scalar_lea.vmem %s1816_s7, %s1665_s19 }
  0x66   : > { %1202 = vmatprep.subr.bf16.mxu0 %v1469_v2  ;;  %v532_v3 = vsel %vm530_vm0, %v525_v1, 0  ;;  %1204 = vmatprep.mubr.msk.bf16.mxu0 %vm1470_vm1, %v1469_v2  ;;  %v1712_v4 = vld [vmem:[%s414_s11] sm:$0xf]  ;;  %v1471_v5 = vmov 16   ;;  %v1318_v6 = vld [vmem:[%s1680_s20] sm:$0xff]   ;;  %vm602_vm3 = vcmask 1040384   ;;  %v950_v61 = vlaneseq }
  0x67   : > { %1203 = vmatpush3.bf16.msra.mxu0 %v532_v3  ;;  %1208 = vmatprep.subr.bf16.mxu1 %v1469_v2  ;;  %v1319_v7 = vld [vmem:[%s1685_s0] sm:$0xff]   ;;  %v1472_v8 = vmov 0   ;;  %v1320_v10 = vld [vmem:[%s1680_s20 + $0x8] ss:$0 sps:$4 sm:$0x11]   ;;  %vm598_vm4 = vcmask 138240  }
  0x68   : > { %1216 = vmatprep.subr.bf16.mxu0 %v1469_v2  ;;  %1212 = vmatprep.mubr.msk.bf16.mxu1 %vm1470_vm1, %v1469_v2  ;;  %v604_v9 = vsel %vm602_vm3, 65535, %v1472_v8  ;;  %v1321_v17 = vld [vmem:[%s1685_s0 + $0x8] ss:$0 sps:$4 sm:$0x11]   ;;  %v1324_v27 = vld [vmem:[%s1695_s12] sm:$0xff]   ;;  %vm777_vm5 = vcmask 261120  }
  0x69   : > { %1317 = vset.pattern.permute.xlu0 %v1471_v5  ;;  %1209 = vmatpush3.bf16.msra.mxu1 %v1319_v7  ;;  %v660_v11 = vand.u32 %v1320_v10, %v604_v9  ;;  %v606_v19 = vand.u32 %v1321_v17, %v604_v9  ;;  %v1162_v29 = vld [vmem:[%s1842_s2] ss:$0 sm:$0xff]  ;;  %v1323_v39 = vld [vmem:[%s1690_s21 + $0x8] sm:$0xff]   ;;  %v951_v62 = vand.u32 127, %v950_v61  ;;  %p1175_p5 = scmp.ne.s32.totalorder %s1548_s17, 2 }
  0x6a   : > { %1205 = vmatmul.mubr.msk.bf16.vlgmr.msra.gmra.mrb[0].mxu0 %vm526_vm2, %v1712_v4  ;;  %1210 = vmatprep.subr.bf16.mxu1 %v1469_v2  ;;  %v1322_v38 = vld [vmem:[%s1690_s21] sm:$0xff]   ;;  %v1325_v40 = vld [vmem:[%s1695_s12 + $0x8] sm:$0xff]  }
  0x6b   : > { %1220 = vmatprep.mubr.msk.bf16.mxu0 %vm1470_vm1, %v1469_v2  ;;  %1217 = vmatpush3.bf16.msra.mxu0 %v1318_v6  ;;  %v1326_v51 = vld [vmem:[%s1700_s25] sm:$0xff]   ;;  %v1327_v52 = vld [vmem:[%s1700_s25 + $0x8] sm:$0xff]   ;;  %vm952_vm6 = vcmp.lt.s32.totalorder %v951_v62, 2 }
  0x6c   : > { %1218 = vmatprep.subr.bf16.mxu0 %v1469_v2  ;;  %v1170_v54 = vld [vmem:[%s1843_s16] ss:$0 sm:$0xff] }
  0x6d   : > { %1211 = vmatpush3.bf16.msra.mxu1 %v606_v19  ;;  %v1171_v63 = vld [vmem:[%s517_s13] ss:$0 sm:$0xff] }
  0x6e   : > { %1224 = vmatprep.subr.bf16.mxu1 %v1469_v2 }
  0x6f   : > { %1219 = vmatpush3.bf16.msra.mxu0 %v660_v11 }
  0x70   : > { %1230 = vmatprep.subr.bf16.mxu0 %v1469_v2 }
  0x72   : > { %1221 = vmatmul.mubr.msk.bf16.vlgmr.msra.gmra.mrb[4].mxu0 %vm598_vm4, %v525_v1 }
  0x73   : > { %1234 = vmatprep.mubr.msk.bf16.mxu0 %vm1470_vm1, %v1469_v2  ;;  %1231 = vmatpush3.bf16.msra.mxu0 %v1324_v27 }
  0x74   : > { %1232 = vmatprep.subr.bf16.mxu0 %v1469_v2 }
  0x77   : > { %1233 = vmatpush3.bf16.msra.mxu0 %v1325_v40 }
  0x78   : > { %1246 = vmatprep.subr.bf16.mxu0 %v1469_v2 }
 0x13d   : > { %v568_v12 = vpop.f32.mrb[0].mxu0 }
 0x13e   : > { %v574_v13 = vadd.f32 1e-07, %v568_v12  ;;  %v1206_v14 = vpop.f32.mrb[1].mxu0 }
 0x13f   : > { %v571_v15 = vpop.f32.mrb[2].mxu0 }
 0x140   : > { %1328 = vrcp.f32 %v574_v13  ;;  %v1207_v16 = vpop.f32.mrb[3].mxu0  ;;  %v963_v13 = vld [vmem:[#allocation2] sm:$0xff] }
 0x145   : > { %v696_v23 = vpop.f32.mrb[4].mxu0 }
 0x146   : > { %v1222_v24 = vpop.f32.mrb[5].mxu0 }
 0x147   : > { %v699_v25 = vpop.f32.mrb[6].mxu0 }
 0x148   : > { %v1223_v26 = vpop.f32.mrb[7].mxu0 }
 0x14a   : > { %v1329_v18 = vpop.eup %1328 }
 0x14b   : > { %578 = vperm.xlu0 %1317, %v1329_v18  }
 0x1ca   : > { %v579_v20 = vpop.permute.xlu0 %578 }
 0x1cb   : > { %v581_v21 = vmul.f32 %v579_v20, %v568_v12 }
 0x1cd   : > { %v582_v22 = vpack.c.bf16 %v581_v21, %v581_v21 }
 0x1cf   : > { %1213 = vmatmul.mubr.msk.bf16.vlgmr.msra.gmra.mrb[0].mxu1 %vm598_vm4, %v582_v22 }
 0x1d0   : > { %1226 = vmatprep.mubr.msk.bf16.mxu1 %vm1470_vm1, %v1469_v2 }
 0x2a2   : > { %v642_v28 = vpop.f32.mrb[0].mxu1 }
 0x2a3   : > { %v697_v30 = vadd.f32 %v696_v23, %v642_v28  ;;  %v1214_v31 = vpop.f32.mrb[1].mxu1 }
 0x2a4   : > { %v645_v32 = vpop.f32.mrb[2].mxu1 }
 0x2a5   : > { %v709_v33 = vadd.f32 %v1162_v29, %v697_v30  ;;  %v1215_v34 = vpop.f32.mrb[3].mxu1 }
 0x2a7   : > { %v710_v35 = vmax.f32 %v709_v33, 0.0 }
 0x2a9   : > { %v711_v36 = vpack.c.bf16 %v710_v35, %v710_v35 }
 0x2ab   : > { %v713_v37 = vsel %vm530_vm0, %v711_v36, 0 }
 0x2ac   : > { %1225 = vmatpush3.bf16.msra.mxu1 %v713_v37 }
 0x2ad   : > { %1238 = vmatprep.subr.bf16.mxu1 %v1469_v2 }
 0x2af   : > { %1227 = vmatmul.mubr.msk.bf16.vlgmr.msra.gmra.mrb[4].mxu1 %vm526_vm2, %v1712_v4 }
 0x2b0   : > { %1239 = vmatpush3.bf16.msra.mxu1 %v1322_v38  ;;  %1242 = vmatprep.mubr.msk.bf16.mxu1 %vm1470_vm1, %v1469_v2 }
 0x2b1   : > { %1240 = vmatprep.subr.bf16.mxu1 %v1469_v2 }
 0x2b4   : > { %1241 = vmatpush3.bf16.msra.mxu1 %v1323_v39 }
 0x2b7   : > { %1243 = vmatmul.mubr.msk.bf16.vlgmr.msra.gmra.mrb[8].mxu1 %vm777_vm5, %v711_v36 }
 0x382   : > { %v749_v41 = vpop.f32.mrb[4].mxu1 }
 0x383   : > { %v755_v42 = vmul.f32 %v749_v41, %v579_v20  ;;  %v1228_v43 = vpop.f32.mrb[5].mxu1 }
 0x384   : > { %v752_v44 = vpop.f32.mrb[6].mxu1 }
 0x385   : > { %v756_v45 = vpack.c.bf16 %v755_v42, %v755_v42  ;;  %v1229_v46 = vpop.f32.mrb[7].mxu1 }
 0x387   : > { %1235 = vmatmul.mubr.msk.bf16.vlgmr.msra.gmra.mrb[8].mxu0 %vm777_vm5, %v756_v45 }
 0x388   : > { %1250 = vmatprep.mubr.msk.bf16.mxu0 %vm1470_vm1, %v1469_v2  ;;  %1247 = vmatpush3.bf16.msra.mxu0 %v1326_v51 }
 0x389   : > { %1248 = vmatprep.subr.bf16.mxu0 %v1469_v2 }
 0x38a   : > { %v869_v47 = vpop.f32.mrb[8].mxu1 }
 0x38b   : > { %v1244_v48 = vpop.f32.mrb[9].mxu1 }
 0x38c   : > { %v872_v49 = vpop.f32.mrb[10].mxu1  ;;  %1249 = vmatpush3.bf16.msra.mxu0 %v1327_v52 }
 0x38d   : > { %v1245_v50 = vpop.f32.mrb[11].mxu1 }
 0x45a   : > { %v815_v53 = vpop.f32.mrb[8].mxu0 }
 0x45b   : > { %v870_v55 = vadd.f32 %v869_v47, %v815_v53  ;;  %v1236_v56 = vpop.f32.mrb[9].mxu0 }
 0x45c   : > { %v818_v57 = vpop.f32.mrb[10].mxu0 }
 0x45d   : > { %v882_v58 = vadd.f32 %v1170_v54, %v870_v55  ;;  %v1237_v59 = vpop.f32.mrb[11].mxu0 }
 0x45f   : > { %v883_v60 = vpack.c.bf16 %v882_v58, %v882_v58 }
 0x461   : > { %1251 = vmatmul.mubr.msk.bf16.vlgmr.msra.gmra.mrb[12].mxu0 %vm777_vm5, %v883_v60 }
 0x534   : > { %v944_v0 = vpop.f32.mrb[12].mxu0 }
 0x535   : > { %v945_v1 = vadd.f32 %v1171_v63, %v944_v0  ;;  %v1252_v2 = vpop.f32.mrb[13].mxu0 }
 0x536   : > { %v947_v3 = vpop.f32.mrb[14].mxu0 }
 0x537   : > { %v1253_v4 = vpop.f32.mrb[15].mxu0  ;;  %v953_v5 = vsel %vm952_vm6, %v945_v1, -inf }
 0x538   : > { %954 = vmax.xlane.f32.xlu0 %v953_v5 }
 0x5c5   : > { %v955_v6 = vpop.xlane.xlu0 %954 }
 0x5c6   : > { %v956_v7 = vsub.f32 %v953_v5, %v955_v6 }
 0x5c8   : > { %v957_v8 = vmul.f32 1.442695, %v956_v7 }
 0x5ca   : > { %1330 = vpow2.f32 %v957_v8 }
 0x5d4   : > { %v1331_v9 = vpop.eup %1330 }
 0x5d5   : > { %959 = vadd.xlane.f32.xlu1 %v1331_v9 }
 0x662   : > { %v960_v10 = vpop.xlane.xlu1 %959 }
 0x663   : > { %1332 = vrcp.f32 %v960_v10 }
 0x66d   : > { %v1333_v11 = vpop.eup %1332 }
 0x66e   : > { %v962_v12 = vmul.f32 %v1333_v11, %v1331_v9  ;;  %970 = sbr.rel (%p1175_p5) target bundleno = 1974 (0x7b6), region = 76 }
 0x670   : > { %v964_v14 = vmul.f32 %v962_v12, %v945_v1 }
 0x672   : > { %v965_v15 = vadd.f32 %v964_v14, %v963_v13 }
 0x674   : > { %966 = vst [vmem:[#allocation2] sm:$0xff] %v965_v15 }
 0x67b   : > { %v971_v16 = vld [vmem:[#allocation2] sm:$0xff] }
 0x67c   : > { %v972_v17 = vsel %vm952_vm6, %v971_v16, -inf }
 0x67d   : > { %973 = vmax.xlane.f32.xlu0 %v972_v17 }
 0x70a   : > { %v974_v18 = vpop.xlane.xlu0 %973 }
 0x70b   : > { %v975_v19 = vsub.f32 %v972_v17, %v974_v18 }
 0x70d   : > { %v976_v20 = vmul.f32 1.442695, %v975_v19 }
 0x70f   : > { %1334 = vpow2.f32 %v976_v20 }
 0x719   : > { %v1335_v21 = vpop.eup %1334 }
 0x71a   : > { %978 = vadd.xlane.f32.xlu0 %v1335_v21 }
 0x7a7   : > { %v979_v22 = vpop.xlane.xlu0 %978 }
 0x7a8   : > { %1336 = vrcp.f32 %v979_v22 }
 0x7b2   : > { %v1337_v23 = vpop.eup %1336 }
 0x7b3   : > { %v981_v24 = vmul.f32 %v1337_v23, %v1335_v21 }
 0x7b5   : > { %982 = vst [vmem:[#allocation8] sm:$0xff] %v981_v24 }
 0x7b6 PF: > { %p1276_p1 = scmp.eq.s32.totalorder %s1548_s17, 2  ;;  %s1473_s19 = smov [#allocation8]  }
 0x7b7   : > { %s990_s20 = sshll.u32 %s1473_s19, 4  ;;  %s991_s20 = int_to_ptr.vmem [resolvable:$true] %s990_s20 }
 0x7b8   : > { %s1396_s27 = scalar_lea.vmem %s991_s20, 128  ;;  %p1403_p12 = scmp.lt.s32.totalorder %s991_s20, %s991_s20 }
 0x7b9   : > { %p1397_p6 = scmp.ne.s32.totalorder %s991_s20, %s1396_s27  ;;  %p1404_p0 = scmp.lt.s32.totalorder %s1396_s27, %s1396_s27 }
 0x7bb   : > { %p1398_p9 = pnand %p1397_p6, %p1276_p1  ;;  %p1405_p2 = por %p1404_p0, %p1403_p12 }
 0x7bd   : > { %p1399_p10 = pneg %p1398_p9 }
 0x7bf   : > { %p1406_p13 = pnand %p1405_p2, %p1399_p10 }
 0x7c1   : > { %1409 = shalt.err (!%p1406_p13)
}
 0x7c2   : > { %s1410_s18 = scalar_lea.hbm %s1819_s10, 128 }
 0x7c3   : > { %p1411_p11 = scmp.ne.s32.totalorder %s1819_s10, %s1410_s18  ;;  %p1416_p7 = scmp.lt.u32.totalorder %s1410_s18, %s1819_s10 }
 0x7c5   : > { %p1412_p3 = pnand %p1411_p11, %p1276_p1 }
 0x7c7   : > { %p1413_p8 = pneg %p1412_p3 }
 0x7c9   : > { %p1418_p4 = pnand %p1416_p7, %p1413_p8 }
 0x7cb   : > { %1421 = shalt.err (!%p1418_p4)
}
 0x7cc   : > { %1262 = dma.vmem_to_hbm [thread:$0]  (%p1276_p1), %s991_s20, 128, %s1819_s10, [#allocation5]  }
 0x7cd   : > { %1447 = dma.done.wait (%p1276_p1), [#allocation5], 128  }
 0x7ce   : > { %1449 = vsyncadd (%p1276_p1), [#allocation5], 4294967168 }
 0x7cf PF: > { %s1844_s1 = sld [smem:[#allocation12_spill]]  ;;  %p22_p5 = scmp.ge.s32.totalorder %s1568_s22, 5  }
 0x7d0   : > { %s1845_s13 = smov %s1456_s14  ;;  %s1846_s14 = smov %s1460_s15 }
 0x7d1   : > { %s1848_s16 = smov %s1568_s22  ;;  %24 = sbr.rel (!%p22_p5) target bundleno = 9 (0x9), region = 133 }
 0x7d5   : > { %s1847_s15 = smov %s1844_s1 }
 0x7d8   :  { %1003 = vsyncpa [#allocation4], 1 }
 0x7d9   :  { %1005 = vsyncpa [#allocation4 + $0x1], 1 }
 0x7da   :  { %1006 = vsyncpa [#allocation7], 1 }
 0x7db   :  { %1007 = vsyncpa [#allocation5], 1 }
 0x7dc   :  { %1009 = vsyncpa [#allocation5 + $0x1], 1 }

</bundles_post_ra>
